<compile_context>
chip_gen: v7x
topology: tpu7x:2x2x1
jax: 0.10.0
libtpu: 0.0.40
codegen_flags: <defaults>
</compile_context>

<pallas_src>
import functools

import jax
import jax.numpy as jnp
from jax import lax
from jax.experimental import pallas as pl
from jax.experimental.pallas import tpu as pltpu


def _discriminator_kernel(x_ref, w1_ref, b1_ref, w2_ref, b2_ref, o_ref, *, mxu_dtype):
    # x_ref:  (TB, D)  activation tile for this batch slice (partial tail tile is padded by
    #         Pallas; padded rows are independent and never written past the (1, B) output).
    # w1_ref: (D, H)   f32, VMEM-resident across the whole grid (constant index map).
    # b1_ref: (1, H)   f32 bias.
    # w2_ref: (1, H)   f32 second-layer weights as a row.
    # b2_ref: (1, 1)   f32 scalar in SMEM.
    # o_ref:  (1, TB)  lane-dense sigmoid outputs for this batch tile.
    x = x_ref[...]
    w1 = w1_ref[...]
    if mxu_dtype is not None and x.dtype != mxu_dtype:
        # In-kernel cast: fast bf16 MXU path on v6e/v7x without an extra wrapper-side HBM
        # pass over x (wrapper astype was net-negative for a bandwidth-bound kernel).
        x = x.astype(mxu_dtype)
        w1 = w1.astype(mxu_dtype)

    # Layer 1 on the MXU with f32 accumulation; bias-add + ReLU on the VPU in f32.
    h = jnp.dot(x, w1, preferred_element_type=jnp.float32)
    h = jnp.maximum(h + b1_ref[...], 0.0)

    # Layer 2: contract (1, H) against (TB, H) along H -> (1, TB). Batch lands on the lane
    # axis, so the per-tile store is lane-dense (no masked (TB, 1) partial stores).
    y = lax.dot_general(
        w2_ref[...], h,
        dimension_numbers=(((1,), (1,)), ((), ())),
        preferred_element_type=jnp.float32,
    )
    y = y + b2_ref[0, 0]

    # Exact sigmoid: the kernel is HBM-bound, so the divide is hidden under DMA.
    o_ref[...] = (1.0 / (1.0 + jnp.exp(-y))).astype(o_ref.dtype)


def _round_up(x, m):
    return ((x + m - 1) // m) * m


def _vmem_limit_bytes():
    # Generation-aware VMEM budget: ~75% of physical VMEM
    # (v5e/v6e: 128 MiB -> 96 MiB, v7x: 64 MiB -> 48 MiB). Conservative fallback = v7x.
    try:
        cap = int(pltpu.get_tpu_info().vmem_capacity_bytes)
    except Exception:
        cap = 64 * 1024 * 1024
    return max(32 * 1024 * 1024, (cap * 3) // 4)


def _choose_block_b(B, D, itemsize, vmem_limit, weight_bytes):
    """Pick the batch tile TB (multiple of 128, or TB == B for small batches)."""
    # HBM-bound: move >= ~2 MiB of activations per grid step to amortize per-step overhead.
    target_rows = max(512, (2 * 1024 * 1024) // max(D * itemsize, 1))
    # Cap so double-buffered x tiles + resident weights stay well inside the VMEM budget.
    budget = max(vmem_limit // 2 - weight_bytes, 512 * 1024)
    cap_rows = max(128, budget // (2 * max(D * itemsize, 1)))
    tb = max(128, min(target_rows, cap_rows))
    tb = (tb // 128) * 128
    if B <= tb:
        if B >= 256:
            # Split into >= 2 grid steps so v7x's two TensorCores both get work.
            tb2 = _round_up((B + 1) // 2, 128)
            tb = tb2 if tb2 < B else B
        else:
            tb = B  # single full-extent block (block dims equal to array dims are allowed)
    return tb


def discriminator_forward(x, w1, b1, w2_row, b2, *, compute_dtype=None):
    """sigmoid(relu(x @ w1 + b1) @ w2_row.T + b2).

    x: (B, D) f32 or bf16; w1: (D, H); b1: (1, H); w2_row: (1, H); b2: (1, 1).
    Returns (B, 1) float32. compute_dtype=jnp.bfloat16 casts x/w1 to bf16 inside the kernel
    before the first matmul (fast MXU path, no extra HBM pass over x).
    """
    B, D = x.shape
    H = w1.shape[1]
    assert w1.shape == (D, H)
    assert b1.shape == (1, H)
    assert w2_row.shape == (1, H)
    assert b2.shape == (1, 1)

    w1_c = w1.astype(jnp.float32)
    b1_c = b1.astype(jnp.float32)
    w2_c = w2_row.astype(jnp.float32)
    b2_c = b2.astype(jnp.float32)

    vmem_limit = _vmem_limit_bytes()
    itemsize = jnp.dtype(x.dtype).itemsize
    weight_bytes = (D * H + 2 * H) * 4
    TB = _choose_block_b(B, D, itemsize, vmem_limit, weight_bytes)
    grid = (pl.cdiv(B, TB),)  # ragged last tile handled by Pallas; no wrapper jnp.pad

    kernel = functools.partial(_discriminator_kernel, mxu_dtype=compute_dtype)

    out_row = pl.pallas_call(
        kernel,
        out_shape=jax.ShapeDtypeStruct((1, B), jnp.float32),
        grid_spec=pl.GridSpec(
            grid=grid,
            in_specs=[
                pl.BlockSpec((TB, D), lambda i: (i, 0)),   # x: walks the batch axis
                pl.BlockSpec((D, H), lambda i: (0, 0)),    # w1: VMEM-resident
                pl.BlockSpec((1, H), lambda i: (0, 0)),    # b1: VMEM-resident
                pl.BlockSpec((1, H), lambda i: (0, 0)),    # w2 row: VMEM-resident
                pl.BlockSpec(memory_space=pltpu.MemorySpace.SMEM),  # b2 scalar in SMEM
            ],
            out_specs=pl.BlockSpec((1, TB), lambda i: (0, i)),  # lane-dense output row
        ),
        compiler_params=pltpu.CompilerParams(
            dimension_semantics=("parallel",),  # shard batch tiles across TCs (v7x)
            vmem_limit_bytes=vmem_limit,
        ),
    )(x, w1_c, b1_c, w2_c, b2_c)

    # (1, B) -> (B, 1)
    return out_row.reshape(B, 1)


def init_params(key, input_size, hidden=128):
    """Synthetic init mirroring nn.Linear shapes. PyTorch stores weight as (out, in);
    we store w1 transposed (in, out) and w2 as a (1, hidden) row."""
    k1, k2, k3, k4 = jax.random.split(key, 4)
    bound1 = 1.0 / jnp.sqrt(input_size)
    w1 = jax.random.uniform(k1, (input_size, hidden), jnp.float32, -bound1, bound1)
    b1 = jax.random.uniform(k2, (1, hidden), jnp.float32, -bound1, bound1)
    bound2 = 1.0 / jnp.sqrt(hidden)
    w2_row = jax.random.uniform(k3, (1, hidden), jnp.float32, -bound2, bound2)
    b2 = jax.random.uniform(k4, (1, 1), jnp.float32, -bound2, bound2)
    return w1, b1, w2_row, b2


def reference_forward(x, w1, b1, w2_row, b2):
    h = jnp.maximum(x @ w1 + b1, 0.0)
    return jax.nn.sigmoid(h @ w2_row.T + b2)


if __name__ == "__main__":
    key = jax.random.PRNGKey(0)
    k_x, k_p, k_x2, k_p2 = jax.random.split(key, 4)

    # Case 1: small batch, single full-extent tile (input_size=32).
    B, D = 8, 32
    x = jax.random.normal(k_x, (B, D), jnp.float32)
    w1, b1, w2_row, b2 = init_params(k_p, D)
    out = jax.block_until_ready(discriminator_forward(x, w1, b1, w2_row, b2))
    ref = reference_forward(x, w1, b1, w2_row, b2)
    assert out.shape == (B, 1)
    assert jnp.allclose(out, ref, atol=1e-5, rtol=0), "mismatch vs reference (case 1)"

    # Case 2: larger batch exercising the multi-step grid with a ragged last tile
    # (B=300 -> TB=256, grid=(2,), second tile partial).
    B2, D2 = 300, 64
    x2 = jax.random.normal(k_x2, (B2, D2), jnp.float32)
    w1b, b1b, w2b, b2b = init_params(k_p2, D2)
    out2 = jax.block_until_ready(discriminator_forward(x2, w1b, b1b, w2b, b2b))
    ref2 = reference_forward(x2, w1b, b1b, w2b, b2b)
    assert out2.shape == (B2, 1)
    assert jnp.allclose(out2, ref2, atol=1e-5, rtol=0), "mismatch vs reference (case 2)"

    # Case 3: bf16 MXU path (cast fused inside the kernel; looser tolerance).
    out3 = jax.block_until_ready(
        discriminator_forward(x2, w1b, b1b, w2b, b2b, compute_dtype=jnp.bfloat16))
    assert jnp.allclose(out3, ref2, atol=3e-2, rtol=0), "mismatch vs reference (case 3)"

    print("KERNEL_OK")
</pallas_src>

<mosaic_0001>
module attributes {stable_mosaic.version = 11 : i64} {
  func.func @_discriminator_kernel(%arg0: i32, %arg1: memref<8x32xf32, #tpu.memory_space<vmem>>, %arg2: memref<32x128xf32, #tpu.memory_space<vmem>>, %arg3: memref<1x128xf32, #tpu.memory_space<vmem>>, %arg4: memref<1x128xf32, #tpu.memory_space<vmem>>, %arg5: memref<1x1xf32, #tpu.memory_space<smem>>, %arg6: memref<1x8xf32, #tpu.memory_space<vmem>>) attributes {dimension_semantics = [#tpu.dimension_semantics<parallel>], iteration_bounds = array<i64: 1>, scalar_prefetch = 0 : i64, scratch_operands = 0 : i64, tpu.core_type = #tpu.core_type<tc>, window_params = [{transform_indices = @transform_0, window_bounds = array<i64: 8, 32>}, {pipeline_mode = #tpu.pipeline_mode<synchronous>, transform_indices = @transform_1, window_bounds = array<i64: 32, 128>}, {pipeline_mode = #tpu.pipeline_mode<synchronous>, transform_indices = @transform_2, window_bounds = array<i64: 1, 128>}, {pipeline_mode = #tpu.pipeline_mode<synchronous>, transform_indices = @transform_3, window_bounds = array<i64: 1, 128>}, {transform_indices = @transform_4, window_bounds = array<i64: 1, 1>}, {transform_indices = @transform_5, window_bounds = array<i64: 1, 8>}]} {
    %c0 = arith.constant 0 : index
    %c0_0 = arith.constant 0 : index
    %0 = vector.load %arg1[%c0, %c0_0] : memref<8x32xf32, #tpu.memory_space<vmem>>, vector<8x32xf32>
    %c0_1 = arith.constant 0 : index
    %c0_2 = arith.constant 0 : index
    %1 = vector.load %arg2[%c0_1, %c0_2] : memref<32x128xf32, #tpu.memory_space<vmem>>, vector<32x128xf32>
    %cst = arith.constant dense<0.000000e+00> : vector<8x128xf32>
    %2 = tpu.matmul %0, %1, %cst {dimension_numbers = #tpu.dot_dimension_numbers<[1], [0], [0], [1], [0, 0, 1, 1], [], []>} : vector<8x32xf32>, vector<32x128xf32>, vector<8x128xf32> -> vector<8x128xf32>
    %c0_3 = arith.constant 0 : index
    %c0_4 = arith.constant 0 : index
    %3 = vector.load %arg3[%c0_3, %c0_4] : memref<1x128xf32, #tpu.memory_space<vmem>>, vector<1x128xf32>
    %4 = vector.broadcast %3 : vector<1x128xf32> to vector<8x128xf32>
    %5 = arith.addf %2, %4 : vector<8x128xf32>
    %cst_5 = arith.constant 0.000000e+00 : f32
    %6 = vector.broadcast %cst_5 : f32 to vector<8x128xf32>
    %7 = arith.maximumf %5, %6 : vector<8x128xf32>
    %c0_6 = arith.constant 0 : index
    %c0_7 = arith.constant 0 : index
    %8 = vector.load %arg4[%c0_6, %c0_7] : memref<1x128xf32, #tpu.memory_space<vmem>>, vector<1x128xf32>
    %cst_8 = arith.constant dense<0.000000e+00> : vector<1x8xf32>
    %9 = tpu.matmul %8, %7, %cst_8 {dimension_numbers = #tpu.dot_dimension_numbers<[1], [1], [0], [0], [0, 0, 1, 0], [], []>} : vector<1x128xf32>, vector<8x128xf32>, vector<1x8xf32> -> vector<1x8xf32>
    %c0_9 = arith.constant 0 : index
    %c0_10 = arith.constant 0 : index
    %10 = memref.load %arg5[%c0_9, %c0_10] : memref<1x1xf32, #tpu.memory_space<smem>>
    %11 = vector.broadcast %10 : f32 to vector<1x8xf32>
    %12 = arith.addf %9, %11 : vector<1x8xf32>
    %cst_11 = arith.constant 0.000000e+00 : f32
    %13 = vector.broadcast %cst_11 : f32 to vector<1x8xf32>
    %14 = arith.subf %13, %12 : vector<1x8xf32>
    %15 = math.exp %14 : vector<1x8xf32>
    %cst_12 = arith.constant 1.000000e+00 : f32
    %16 = vector.broadcast %cst_12 : f32 to vector<1x8xf32>
    %17 = arith.addf %16, %15 : vector<1x8xf32>
    %cst_13 = arith.constant 1.000000e+00 : f32
    %18 = vector.broadcast %cst_13 : f32 to vector<1x8xf32>
    %19 = arith.divf %18, %17 : vector<1x8xf32>
    %c0_14 = arith.constant 0 : index
    %c0_15 = arith.constant 0 : index
    %20 = vector.load %arg6[%c0_14, %c0_15] : memref<1x8xf32, #tpu.memory_space<vmem>>, vector<1x8xf32>
    tpu.vector_store %arg6[%c0_14, %c0_15], %19 {strides = array<i32>} : memref<1x8xf32, #tpu.memory_space<vmem>>, vector<1x8xf32>,
    return
  }
  func.func @transform_0(%arg0: i32) -> (i32, i32) {
    %c0_i32 = arith.constant 0 : i32
    %c0_i32_0 = arith.constant 0 : i32
    return %arg0, %c0_i32 : i32, i32
  }
  func.func @transform_1(%arg0: i32) -> (i32, i32) {
    %c0_i32 = arith.constant 0 : i32
    %c0_i32_0 = arith.constant 0 : i32
    %c0_i32_1 = arith.constant 0 : i32
    return %c0_i32, %c0_i32_0 : i32, i32
  }
  func.func @transform_2(%arg0: i32) -> (i32, i32) {
    %c0_i32 = arith.constant 0 : i32
    %c0_i32_0 = arith.constant 0 : i32
    %c0_i32_1 = arith.constant 0 : i32
    return %c0_i32, %c0_i32_0 : i32, i32
  }
  func.func @transform_3(%arg0: i32) -> (i32, i32) {
    %c0_i32 = arith.constant 0 : i32
    %c0_i32_0 = arith.constant 0 : i32
    %c0_i32_1 = arith.constant 0 : i32
    return %c0_i32, %c0_i32_0 : i32, i32
  }
  func.func @transform_4(%arg0: i32) -> (i32, i32) {
    %c0_i32 = arith.constant 0 : i32
    %c0_i32_0 = arith.constant 0 : i32
    %c0_i32_1 = arith.constant 0 : i32
    return %c0_i32, %c0_i32_0 : i32, i32
  }
  func.func @transform_5(%arg0: i32) -> (i32, i32) {
    %c0_i32 = arith.constant 0 : i32
    %c0_i32_0 = arith.constant 0 : i32
    return %c0_i32, %arg0 : i32, i32
  }
}

</mosaic_0001>

<bundles_post_ra>
// kernel: tpu_custom_call.1
= control target key start
LH: loop header
LB: loop body
LE: loop exit
PB: predicated region body
PF: predicated region fallthrough
CT: control target
= control target key end

     0   :  { %11 = vsyncpa [#allocation4], 0  ;;  %s437_s0 = inlined_call_operand.hbm [shape: f32[8,32], index: 0, kind: input, shape index: {}]   ;;  %s438_s1 = inlined_call_operand.hbm [shape: f32[32,128], index: 1, kind: input, shape index: {}]   ;;  %s439_s2 = inlined_call_operand.vmem [shape: f32[1,128], index: 2, kind: input, shape index: {}]   ;;  %s440_s3 = inlined_call_operand.vmem [shape: f32[1,128], index: 3, kind: input, shape index: {}]   ;;  %s441_s4 = inlined_call_operand.<no memory space> [shape: f32[1,1], index: 4, kind: input, shape index: {}]   ;;  %s442_s5 = inlined_call_operand.hbm [shape: f32[1,8], index: 5, kind: output, shape index: {}]  }
   0x1   :  { %12 = vsyncpa [#allocation7], 0 }
   0x2   :  { %13 = vsyncpa [#allocation5], 0  ;;  %s347_s18 = smov [#allocation3]   ;;  %s348_s20 = smov [#allocation6]  }
   0x3   :  { %s20_s19 = sshll.u32 %s347_s18, 4  ;;  %s29_s21 = sshll.u32 %s348_s20, 4  ;;  %s21_s19 = int_to_ptr.vmem [resolvable:$true] %s20_s19  ;;  %s385_s21 = int_to_ptr.vmem [resolvable:$true] %s29_s21 }
   0x4   :  { %s275_s24 = scalar_lea.hbm %s437_s0, 128 }
   0x5   :  { %p276_p0 = scmp.ne.s32.totalorder %s437_s0, %s275_s24  ;;  %p279_p1 = scmp.lt.u32.totalorder %s275_s24, %s437_s0 }
   0x7   :  { %p281_p2 = pnand %p279_p1, %p276_p0 }
   0x9   :  { %284 = shalt.err (!%p281_p2)
}
   0xa   :  { %s285_s29 = scalar_lea.vmem %s21_s19, 128  ;;  %p290_p4 = scmp.lt.s32.totalorder %s21_s19, %s21_s19 }
   0xb   :  { %p286_p3 = scmp.ne.s32.totalorder %s21_s19, %s285_s29  ;;  %p291_p5 = scmp.lt.s32.totalorder %s285_s29, %s285_s29 }
   0xd   :  { %p292_p6 = por %p291_p5, %p290_p4 }
   0xf   :  { %p293_p7 = pnand %p292_p6, %p286_p3 }
  0x11   :  { %296 = shalt.err (!%p293_p7)
}
  0x12   :  { %23 = dma.hbm_to_vmem [thread:$0]  %s437_s0, 128, %s21_s19, [#allocation4]  }
  0x13   :  { %s297_s9 = scalar_lea.hbm %s438_s1, 512 }
  0x14   :  { %p298_p8 = scmp.ne.s32.totalorder %s438_s1, %s297_s9  ;;  %p301_p9 = scmp.lt.u32.totalorder %s297_s9, %s438_s1 }
  0x16   :  { %p303_p10 = pnand %p301_p9, %p298_p8 }
  0x18   :  { %306 = shalt.err (!%p303_p10)
}
  0x19   :  { %s307_s14 = scalar_lea.vmem %s385_s21, 512  ;;  %p312_p12 = scmp.lt.s32.totalorder %s385_s21, %s385_s21 }
  0x1a   :  { %p308_p11 = scmp.ne.s32.totalorder %s385_s21, %s307_s14  ;;  %p313_p13 = scmp.lt.s32.totalorder %s307_s14, %s307_s14 }
  0x1c   :  { %p314_p0 = por %p313_p13, %p312_p12 }
  0x1e   :  { %p315_p1 = pnand %p314_p0, %p308_p11 }
  0x20   :  { %318 = shalt.err (!%p315_p1)
}
  0x21   :  { %s349_s0 = smov 128   ;;  %s350_s15 = smov 8  }
  0x22   :  { %35 = dma.hbm_to_vmem [thread:$0]  %s438_s1, 512, %s385_s21, [#allocation7], %s349_s0, %s349_s0, %s350_s15  }
  0x23   :  { %341 = dma.done.wait [#allocation4], 128  }
  0x24   :  { %342 = vsyncadd [#allocation4], 4294967168 }
  0x25   :  { %343 = dma.done.wait [#allocation7], 512  }
  0x26   :  { %344 = vsyncadd [#allocation7], 4294966784  ;;  %v351_v0 = vmov 0.0|0.0   ;;  %vm352_vm0 = vmmov 0   ;;  %v353_v1 = vmov 0.0   ;;  %v49_v2 = vld [vmem:[#allocation6] sm:$0xff]  ;;  %v137_v15 = vstv %s441_s4 }
  0x27   :  { %257 = vmatprep.subr.bf16.mxu0 %v351_v0  ;;  %249 = vmatprep.mubr.msk.f32.mxu0 %vm352_vm0, %v353_v1  ;;  %v50_v3 = vld [vmem:[#allocation6 + $0x8] sm:$0xff]  ;;  %v51_v4 = vld [vmem:[#allocation6 + $0x10] sm:$0xff]  ;;  %v52_v6 = vld [vmem:[#allocation6 + $0x18] sm:$0xff]  ;;  %vm60_vm1 = vcmask 261120   ;;  %vm214_vm2 = vcmask 57344  }
  0x28   :  { %252 = vmatprep.subr.mxu1 %v353_v1  ;;  %254 = vmatprep.mubr.msk.f32.mxu1 %vm352_vm0, %v353_v1  ;;  %v258_v5 = vpack.c.bf16 %v50_v3, %v49_v2  ;;  %v261_v7 = vpack.c.bf16 %v52_v6, %v51_v4  ;;  %v48_v8 = vld [vmem:[#allocation3] sm:$0xff] }
  0x29   :  { %v232_v9 = vld [vmem:[%s439_s2] ss:$0 sm:$0xff]  ;;  %s354_s2 = smov [#allocation8]  }
  0x2a   :  { %259 = vmatpush3.bf16.msra.mxu0 %v258_v5  ;;  %v135_v14 = vld [vmem:[%s440_s3] sm:$0x1]  ;;  %s222_s23 = sshll.u32 %s354_s2, 4  ;;  %s223_s23 = int_to_ptr.vmem [resolvable:$true] %s222_s23 }
  0x2b   :  { %260 = vmatprep.subr.bf16.mxu0 %v351_v0  ;;  %s319_s3 = scalar_lea.vmem %s223_s23, 16  ;;  %s323_s24 = scalar_lea.vmem %s223_s23, 32 }
  0x2c   :  { %p320_p2 = scmp.ne.s32.totalorder %s223_s23, %s319_s3  ;;  %p324_p3 = scmp.lt.s32.totalorder %s223_s23, %s223_s23 }
  0x2d   :  { %p325_p4 = scmp.lt.s32.totalorder %s323_s24, %s319_s3 }
  0x2e   :  { %262 = vmatpush3.bf16.msra.mxu0 %v261_v7 }
  0x2f   :  { %p326_p5 = por %p325_p4, %p324_p3 }
  0x31   :  { %250 = vmatmul.mubr.msk.f32.vlgmr.msra.gmra.mrb[0].mxu0 %vm60_vm1, %v48_v8  ;;  %p327_p6 = pnand %p326_p5, %p320_p2 }
 0x104   :  { %v130_v10 = vpop.f32.mrb[0].mxu0 }
 0x105   :  { %v131_v11 = vadd.f32 %v232_v9, %v130_v10  ;;  %v251_v12 = vpop.f32.mrb[1].mxu0 }
 0x107   :  { %v134_v13 = vmax.f32 %v131_v11, 0.0 }
 0x109   :  { %253 = vmatpush3.xpose.msra.mxu1 %v134_v13 }
 0x10c   :  { %255 = vmatmul.mubr.f32.vlgmr.msra.gmra.mrb[0].mxu1 %v135_v14 }
 0x1df   :  { %v204_v16 = vpop.f32.mrb[0].mxu1 }
 0x1e0   :  { %v205_v17 = vadd.f32 %v204_v16, %v137_v15  ;;  %v256_v18 = vpop.f32.mrb[1].mxu1 }
 0x1e2   :  { %v208_v19 = vsub.f32 0.0, %v205_v17 }
 0x1e4   :  { %v209_v20 = vmul.f32 1.442695, %v208_v19 }
 0x1e6   :  { %271 = vpow2.f32 %v209_v20 }
 0x1f0   :  { %v272_v21 = vpop.eup %271 }
 0x1f1   :  { %v211_v22 = vadd.f32 1.0, %v272_v21 }
 0x1f3   :  { %273 = vrcp.f32 %v211_v22 }
 0x1fd   :  { %v274_v23 = vpop.eup %273 }
 0x1fe   :  { %215 = vst.msk [vmem:[#allocation8] sm:$0x1] %vm214_vm2, %v274_v23 }
 0x1ff   :  { %330 = shalt.err (!%p327_p6)
}
 0x200   :  { %s331_s26 = scalar_lea.hbm %s442_s5, 16 }
 0x201   :  { %p332_p7 = scmp.ne.s32.totalorder %s442_s5, %s331_s26  ;;  %p335_p8 = scmp.lt.u32.totalorder %s331_s26, %s442_s5 }
 0x203   :  { %p337_p9 = pnand %p335_p8, %p332_p7 }
 0x205   :  { %340 = shalt.err (!%p337_p9)
}
 0x206   :  { %225 = dma.vmem_to_hbm [thread:$0]  %s223_s23, 16, %s442_s5, [#allocation5]  }
 0x207   :  { %345 = dma.done.wait [#allocation5], 16  }
 0x208   :  { %346 = vsyncadd [#allocation5], 4294967280 }
 0x209   :  { %229 = vsyncpa [#allocation4], 1 }
 0x20a   :  { %230 = vsyncpa [#allocation7], 1 }
 0x20b   :  { %231 = vsyncpa [#allocation5], 1 }

</bundles_post_ra>
